<compile_context>
chip_gen: v7x
topology: tpu7x:2x2x1
jax: 0.10.0
libtpu: 0.0.40
codegen_flags: <defaults>
</compile_context>

<pallas_src>
import jax
import jax.numpy as jnp
from jax.experimental import pallas as pl
from jax.experimental.pallas import tpu as pltpu

LANE = 128
SUBLANE = 8
MAX_TILE_B = 1024


def _round_up(x, m):
    return (x + m - 1) // m * m


# ---------------------------------------------------------------------------
# Kernel: fused twin-Q MLP.  All operands are VMEM tiles.
#   x:(TB, S+A) bf16   w1:(S+A,HP) w2:(HP,HP) w3:(HP,OP) bf16
#   b1:(1,HP) b2:(1,HP) b3:(1,OP) f32          out:(TB, OP) f32
# ---------------------------------------------------------------------------
def _critic_kernel(x_ref, w1_ref, b1_ref, w2_ref, b2_ref, w3_ref, b3_ref, out_ref):
    # Layer 1: fused [obs | act] @ W1 — single MXU push, f32 accumulation.
    h = jnp.dot(x_ref[...], w1_ref[...], preferred_element_type=jnp.float32)
    h = jnp.maximum(h + b1_ref[...], 0.0)
    # Layer 2 (block-diagonal: net1 / net2 hidden units never mix).
    h = jnp.dot(h.astype(jnp.bfloat16), w2_ref[...],
                preferred_element_type=jnp.float32)
    h = jnp.maximum(h + b2_ref[...], 0.0)
    # Layer 3: lane-dense (TB, 128) output; lane 0 = q1, lane 1 = q2.
    out_ref[...] = (jnp.dot(h.astype(jnp.bfloat16), w3_ref[...],
                            preferred_element_type=jnp.float32) + b3_ref[...])


# ---------------------------------------------------------------------------
# Parameter init (torch nn.Linear-style) + one-time host-side fused packing.
# ---------------------------------------------------------------------------
def init_raw_params(key, state_size, actions_size, hidden_size):
    """Per-net weights, layout (in_features, out_features); biases (1, out)."""
    in_dim = state_size + actions_size

    def linear(k, fan_in, fan_out):
        kw, kb = jax.random.split(k)
        bound = 1.0 / jnp.sqrt(jnp.float32(fan_in))
        w = jax.random.uniform(kw, (fan_in, fan_out), jnp.float32, -bound, bound)
        b = jax.random.uniform(kb, (1, fan_out), jnp.float32, -bound, bound)
        return w, b

    keys = jax.random.split(key, 6)
    w1a, b1a = linear(keys[0], in_dim, hidden_size)
    w2a, b2a = linear(keys[1], hidden_size, hidden_size)
    w3a, b3a = linear(keys[2], hidden_size, 1)
    w1b, b1b = linear(keys[3], in_dim, hidden_size)
    w2b, b2b = linear(keys[4], hidden_size, hidden_size)
    w3b, b3b = linear(keys[5], hidden_size, 1)
    return dict(w1a=w1a, b1a=b1a, w2a=w2a, b2a=b2a, w3a=w3a, b3a=b3a,
                w1b=w1b, b1b=b1b, w2b=w2b, b2b=b2b, w3b=w3b, b3b=b3b)


def pack_params(raw, state_size, actions_size, hidden_size):
    """Fuse net1/net2 into block-diagonal weights, padded to 128-lane tiles.

    Done ONCE outside the kernel.  Matmul operands are stored as bf16 (fast MXU
    path, half the weight DMA/VMEM); biases stay f32 (added to f32 accumulator).
    """
    H = hidden_size
    H2 = 2 * H
    HP = _round_up(H2, LANE)   # fused hidden width, lane-aligned
    OP = LANE                  # padded output width (q1 -> lane 0, q2 -> lane 1)
    in_dim = state_size + actions_size

    w1 = jnp.zeros((in_dim, HP), jnp.float32)
    w1 = w1.at[:, :H].set(raw["w1a"]).at[:, H:H2].set(raw["w1b"])
    b1 = jnp.zeros((1, HP), jnp.float32)
    b1 = b1.at[:, :H].set(raw["b1a"]).at[:, H:H2].set(raw["b1b"])

    w2 = jnp.zeros((HP, HP), jnp.float32)
    w2 = w2.at[:H, :H].set(raw["w2a"]).at[H:H2, H:H2].set(raw["w2b"])
    b2 = jnp.zeros((1, HP), jnp.float32)
    b2 = b2.at[:, :H].set(raw["b2a"]).at[:, H:H2].set(raw["b2b"])

    w3 = jnp.zeros((HP, OP), jnp.float32)
    w3 = w3.at[:H, 0:1].set(raw["w3a"]).at[H:H2, 1:2].set(raw["w3b"])
    b3 = jnp.zeros((1, OP), jnp.float32)
    b3 = b3.at[:, 0:1].set(raw["b3a"]).at[:, 1:2].set(raw["b3b"])

    return dict(w1=w1.astype(jnp.bfloat16), b1=b1,
                w2=w2.astype(jnp.bfloat16), b2=b2,
                w3=w3.astype(jnp.bfloat16), b3=b3)


# ---------------------------------------------------------------------------
# Forward wrapper.
# ---------------------------------------------------------------------------
@jax.jit
def critic_net_forward(observation, actions, packed):
    B, S = observation.shape
    A = actions.shape[1]
    F = S + A
    HP = packed["w2"].shape[0]
    OP = packed["w3"].shape[1]

    # Single fused / cast activation buffer (one XLA op; no per-call zero-pad
    # copies, no batch padding).
    x = jnp.concatenate([observation, actions], axis=1).astype(jnp.bfloat16)

    # Batch tiling:
    #   * small B: one block covering the whole (unpadded) batch.
    #   * moderate B: split in two 8-aligned tiles so ("parallel",) distributes
    #     work across both v7x TensorCores.
    #   * large B: 1024-row tiles; a partial last block is masked by Pallas.
    if B <= 256:
        tile_b = B
    elif B <= 2 * MAX_TILE_B:
        tile_b = _round_up(pl.cdiv(B, 2), SUBLANE)
    else:
        tile_b = MAX_TILE_B
    grid = (pl.cdiv(B, tile_b),)

    def _w_spec(shape):
        # Weights never change across grid steps -> constant index_map keeps them
        # VMEM-resident.  For big fused hidden widths, single-buffer them.
        if HP >= 1024:
            return pl.BlockSpec(shape, lambda i: (0, 0),
                                pipeline_mode=pl.Buffered(1))
        return pl.BlockSpec(shape, lambda i: (0, 0))

    in_specs = [
        pl.BlockSpec((tile_b, F), lambda i: (i, 0)),   # streamed activations
        _w_spec((F, HP)),
        _w_spec((1, HP)),
        _w_spec((HP, HP)),
        _w_spec((1, HP)),
        _w_spec((HP, OP)),
        _w_spec((1, OP)),
    ]

    flops = 2 * B * (F * HP + HP * HP + HP * OP)
    bytes_accessed = (x.size * 2 + B * OP * 4
                      + (packed["w1"].size + packed["w2"].size
                         + packed["w3"].size) * 2
                      + (packed["b1"].size + packed["b2"].size
                         + packed["b3"].size) * 4)

    cp_kwargs = dict(dimension_semantics=("parallel",))
    if HP >= 1024:
        # Large fused hidden width: leave explicit room for the resident bf16
        # weights + streamed activation tiles inside v7x's 64 MiB part.
        cp_kwargs["vmem_limit_bytes"] = 60 * 1024 * 1024

    out = pl.pallas_call(
        _critic_kernel,
        out_shape=jax.ShapeDtypeStruct((B, OP), jnp.float32),
        grid=grid,
        in_specs=in_specs,
        out_specs=pl.BlockSpec((tile_b, OP), lambda i: (i, 0)),
        compiler_params=pltpu.CompilerParams(**cp_kwargs),
        cost_estimate=pl.CostEstimate(flops=flops, transcendentals=0,
                                      bytes_accessed=bytes_accessed),
    )(x, packed["w1"], packed["b1"], packed["w2"], packed["b2"],
      packed["w3"], packed["b3"])

    return out[:, 0:1], out[:, 1:2]


# ---------------------------------------------------------------------------
# Pure-JAX references on the UNPACKED params.
# ---------------------------------------------------------------------------
def _reference_forward_f32(observation, actions, raw):
    """Matches the torch module exactly (full f32)."""
    x = jnp.concatenate([observation, actions], axis=1)

    def mlp(p):
        h = jnp.maximum(x @ raw["w1" + p] + raw["b1" + p], 0.0)
        h = jnp.maximum(h @ raw["w2" + p] + raw["b2" + p], 0.0)
        return h @ raw["w3" + p] + raw["b3" + p]

    return mlp("a"), mlp("b")


def _reference_forward_bf16(observation, actions, raw):
    """Same numerics as the kernel: bf16 matmul operands, f32 accumulation."""
    x = jnp.concatenate([observation, actions], axis=1).astype(jnp.bfloat16)

    def dot(a, w):
        return jnp.dot(a.astype(jnp.bfloat16), w.astype(jnp.bfloat16),
                       preferred_element_type=jnp.float32)

    def mlp(p):
        h = jnp.maximum(dot(x, raw["w1" + p]) + raw["b1" + p], 0.0)
        h = jnp.maximum(dot(h, raw["w2" + p]) + raw["b2" + p], 0.0)
        return dot(h, raw["w3" + p]) + raw["b3" + p]

    return mlp("a"), mlp("b")


if __name__ == "__main__":
    state_size = 8
    actions_size = 4
    hidden_size = 32
    batch = 2

    key = jax.random.PRNGKey(0)
    k_obs, k_act, k_params = jax.random.split(key, 3)

    observation = jax.random.normal(k_obs, (batch, state_size), jnp.float32)
    actions = jax.random.normal(k_act, (batch, actions_size), jnp.float32)

    raw = init_raw_params(k_params, state_size, actions_size, hidden_size)
    packed = pack_params(raw, state_size, actions_size, hidden_size)
    packed = jax.tree_util.tree_map(jax.block_until_ready, packed)  # pack once

    q1, q2 = critic_net_forward(observation, actions, packed)
    jax.block_until_ready((q1, q2))

    assert q1.shape == (batch, 1) and q2.shape == (batch, 1)

    # Tight check vs a pure-JAX twin-MLP with identical bf16 operands / f32 acc.
    r1, r2 = _reference_forward_bf16(observation, actions, raw)
    assert jnp.allclose(q1, r1, atol=1e-3, rtol=1e-3), "net1 mismatch vs bf16 reference"
    assert jnp.allclose(q2, r2, atol=1e-3, rtol=1e-3), "net2 mismatch vs bf16 reference"

    # Loose sanity check vs the full-f32 torch-equivalent reference
    # (bounds the bf16 weight-quantization drift of the Q values).
    f1, f2 = _reference_forward_f32(observation, actions, raw)
    assert jnp.allclose(q1, f1, atol=5e-2, rtol=5e-2), "net1 drifted vs f32 reference"
    assert jnp.allclose(q2, f2, atol=5e-2, rtol=5e-2), "net2 drifted vs f32 reference"

    print("KERNEL_OK")
</pallas_src>

<mosaic_0001>
module attributes {stable_mosaic.version = 11 : i64} {
  func.func @_critic_kernel(%arg0: i32, %arg1: memref<2x12xbf16, #tpu.memory_space<vmem>>, %arg2: memref<12x128xbf16, #tpu.memory_space<vmem>>, %arg3: memref<1x128xf32, #tpu.memory_space<vmem>>, %arg4: memref<128x128xbf16, #tpu.memory_space<vmem>>, %arg5: memref<1x128xf32, #tpu.memory_space<vmem>>, %arg6: memref<128x128xbf16, #tpu.memory_space<vmem>>, %arg7: memref<1x128xf32, #tpu.memory_space<vmem>>, %arg8: memref<2x128xf32, #tpu.memory_space<vmem>>) attributes {dimension_semantics = [#tpu.dimension_semantics<parallel>], iteration_bounds = array<i64: 1>, scalar_prefetch = 0 : i64, scratch_operands = 0 : i64, tpu.core_type = #tpu.core_type<tc>, window_params = [{transform_indices = @transform_0, window_bounds = array<i64: 2, 12>}, {pipeline_mode = #tpu.pipeline_mode<synchronous>, transform_indices = @transform_1, window_bounds = array<i64: 12, 128>}, {pipeline_mode = #tpu.pipeline_mode<synchronous>, transform_indices = @transform_2, window_bounds = array<i64: 1, 128>}, {pipeline_mode = #tpu.pipeline_mode<synchronous>, transform_indices = @transform_3, window_bounds = array<i64: 128, 128>}, {pipeline_mode = #tpu.pipeline_mode<synchronous>, transform_indices = @transform_4, window_bounds = array<i64: 1, 128>}, {pipeline_mode = #tpu.pipeline_mode<synchronous>, transform_indices = @transform_5, window_bounds = array<i64: 128, 128>}, {pipeline_mode = #tpu.pipeline_mode<synchronous>, transform_indices = @transform_6, window_bounds = array<i64: 1, 128>}, {transform_indices = @transform_7, window_bounds = array<i64: 2, 128>}]} {
    %c0 = arith.constant 0 : index
    %c0_0 = arith.constant 0 : index
    %0 = vector.load %arg1[%c0, %c0_0] : memref<2x12xbf16, #tpu.memory_space<vmem>>, vector<2x12xbf16>
    %c0_1 = arith.constant 0 : index
    %c0_2 = arith.constant 0 : index
    %1 = vector.load %arg2[%c0_1, %c0_2] : memref<12x128xbf16, #tpu.memory_space<vmem>>, vector<12x128xbf16>
    %cst = arith.constant dense<0.000000e+00> : vector<2x128xf32>
    %2 = tpu.matmul %0, %1, %cst {dimension_numbers = #tpu.dot_dimension_numbers<[1], [0], [0], [1], [0, 0, 1, 1], [], []>} : vector<2x12xbf16>, vector<12x128xbf16>, vector<2x128xf32> -> vector<2x128xf32>
    %c0_3 = arith.constant 0 : index
    %c0_4 = arith.constant 0 : index
    %3 = vector.load %arg3[%c0_3, %c0_4] : memref<1x128xf32, #tpu.memory_space<vmem>>, vector<1x128xf32>
    %4 = vector.broadcast %3 : vector<1x128xf32> to vector<2x128xf32>
    %5 = arith.addf %2, %4 : vector<2x128xf32>
    %cst_5 = arith.constant 0.000000e+00 : f32
    %6 = vector.broadcast %cst_5 : f32 to vector<2x128xf32>
    %7 = arith.maximumf %5, %6 : vector<2x128xf32>
    %8 = arith.truncf %7 : vector<2x128xf32> to vector<2x128xbf16>
    %c0_6 = arith.constant 0 : index
    %c0_7 = arith.constant 0 : index
    %9 = vector.load %arg4[%c0_6, %c0_7] : memref<128x128xbf16, #tpu.memory_space<vmem>>, vector<128x128xbf16>
    %cst_8 = arith.constant dense<0.000000e+00> : vector<2x128xf32>
    %10 = tpu.matmul %8, %9, %cst_8 {dimension_numbers = #tpu.dot_dimension_numbers<[1], [0], [0], [1], [0, 0, 1, 1], [], []>} : vector<2x128xbf16>, vector<128x128xbf16>, vector<2x128xf32> -> vector<2x128xf32>
    %c0_9 = arith.constant 0 : index
    %c0_10 = arith.constant 0 : index
    %11 = vector.load %arg5[%c0_9, %c0_10] : memref<1x128xf32, #tpu.memory_space<vmem>>, vector<1x128xf32>
    %12 = vector.broadcast %11 : vector<1x128xf32> to vector<2x128xf32>
    %13 = arith.addf %10, %12 : vector<2x128xf32>
    %cst_11 = arith.constant 0.000000e+00 : f32
    %14 = vector.broadcast %cst_11 : f32 to vector<2x128xf32>
    %15 = arith.maximumf %13, %14 : vector<2x128xf32>
    %16 = arith.truncf %15 : vector<2x128xf32> to vector<2x128xbf16>
    %c0_12 = arith.constant 0 : index
    %c0_13 = arith.constant 0 : index
    %17 = vector.load %arg6[%c0_12, %c0_13] : memref<128x128xbf16, #tpu.memory_space<vmem>>, vector<128x128xbf16>
    %cst_14 = arith.constant dense<0.000000e+00> : vector<2x128xf32>
    %18 = tpu.matmul %16, %17, %cst_14 {dimension_numbers = #tpu.dot_dimension_numbers<[1], [0], [0], [1], [0, 0, 1, 1], [], []>} : vector<2x128xbf16>, vector<128x128xbf16>, vector<2x128xf32> -> vector<2x128xf32>
    %c0_15 = arith.constant 0 : index
    %c0_16 = arith.constant 0 : index
    %19 = vector.load %arg7[%c0_15, %c0_16] : memref<1x128xf32, #tpu.memory_space<vmem>>, vector<1x128xf32>
    %20 = vector.broadcast %19 : vector<1x128xf32> to vector<2x128xf32>
    %21 = arith.addf %18, %20 : vector<2x128xf32>
    %c0_17 = arith.constant 0 : index
    %c0_18 = arith.constant 0 : index
    %22 = vector.load %arg8[%c0_17, %c0_18] : memref<2x128xf32, #tpu.memory_space<vmem>>, vector<2x128xf32>
    tpu.vector_store %arg8[%c0_17, %c0_18], %21 {strides = array<i32>} : memref<2x128xf32, #tpu.memory_space<vmem>>, vector<2x128xf32>,
    return
  }
  func.func @transform_0(%arg0: i32) -> (i32, i32) {
    %c0_i32 = arith.constant 0 : i32
    %c0_i32_0 = arith.constant 0 : i32
    return %arg0, %c0_i32 : i32, i32
  }
  func.func @transform_1(%arg0: i32) -> (i32, i32) {
    %c0_i32 = arith.constant 0 : i32
    %c0_i32_0 = arith.constant 0 : i32
    %c0_i32_1 = arith.constant 0 : i32
    return %c0_i32, %c0_i32_0 : i32, i32
  }
  func.func @transform_2(%arg0: i32) -> (i32, i32) {
    %c0_i32 = arith.constant 0 : i32
    %c0_i32_0 = arith.constant 0 : i32
    %c0_i32_1 = arith.constant 0 : i32
    return %c0_i32, %c0_i32_0 : i32, i32
  }
  func.func @transform_3(%arg0: i32) -> (i32, i32) {
    %c0_i32 = arith.constant 0 : i32
    %c0_i32_0 = arith.constant 0 : i32
    %c0_i32_1 = arith.constant 0 : i32
    return %c0_i32, %c0_i32_0 : i32, i32
  }
  func.func @transform_4(%arg0: i32) -> (i32, i32) {
    %c0_i32 = arith.constant 0 : i32
    %c0_i32_0 = arith.constant 0 : i32
    %c0_i32_1 = arith.constant 0 : i32
    return %c0_i32, %c0_i32_0 : i32, i32
  }
  func.func @transform_5(%arg0: i32) -> (i32, i32) {
    %c0_i32 = arith.constant 0 : i32
    %c0_i32_0 = arith.constant 0 : i32
    %c0_i32_1 = arith.constant 0 : i32
    return %c0_i32, %c0_i32_0 : i32, i32
  }
  func.func @transform_6(%arg0: i32) -> (i32, i32) {
    %c0_i32 = arith.constant 0 : i32
    %c0_i32_0 = arith.constant 0 : i32
    %c0_i32_1 = arith.constant 0 : i32
    return %c0_i32, %c0_i32_0 : i32, i32
  }
  func.func @transform_7(%arg0: i32) -> (i32, i32) {
    %c0_i32 = arith.constant 0 : i32
    %c0_i32_0 = arith.constant 0 : i32
    return %arg0, %c0_i32 : i32, i32
  }
}

</mosaic_0001>

<bundles_post_ra>
// kernel: critic_net_forward.1
= control target key start
LH: loop header
LB: loop body
LE: loop exit
PB: predicated region body
PF: predicated region fallthrough
CT: control target
= control target key end

     0   :  { %12 = vsyncpa [#allocation3], 0  ;;  %s620_s0 = inlined_call_operand.vmem [shape: bf16[2,12], index: 0, kind: input, shape index: {}]   ;;  %s621_s1 = inlined_call_operand.vmem [shape: bf16[12,128], index: 1, kind: input, shape index: {}]   ;;  %s622_s2 = inlined_call_operand.vmem [shape: f32[1,128], index: 2, kind: input, shape index: {}]   ;;  %s623_s3 = inlined_call_operand.hbm [shape: bf16[128,128], index: 3, kind: input, shape index: {}]   ;;  %s624_s4 = inlined_call_operand.vmem [shape: f32[1,128], index: 4, kind: input, shape index: {}]   ;;  %s625_s5 = inlined_call_operand.hbm [shape: bf16[128,128], index: 5, kind: input, shape index: {}]   ;;  %s626_s6 = inlined_call_operand.vmem [shape: f32[1,128], index: 6, kind: input, shape index: {}]   ;;  %s627_s7 = inlined_call_operand.vmem [shape: f32[2,128], index: 7, kind: output, shape index: {}]  }
   0x1   :  { %13 = vsyncpa [#allocation5], 0  ;;  %s509_s24 = smov [#allocation2]   ;;  %s461_s28 = scalar_lea.hbm %s623_s3, 1024 }
   0x2   :  { %s25_s25 = sshll.u32 %s509_s24, 4  ;;  %p462_p0 = scmp.ne.s32.totalorder %s623_s3, %s461_s28  ;;  %s26_s25 = int_to_ptr.vmem [resolvable:$true] %s25_s25 }
   0x3   :  { %p465_p1 = scmp.lt.u32.totalorder %s461_s28, %s623_s3 }
   0x5   :  { %p467_p2 = pnand %p465_p1, %p462_p0 }
   0x7   :  { %470 = shalt.err (!%p467_p2)
}
   0x8   :  { %s471_s10 = scalar_lea.vmem %s26_s25, 1024  ;;  %p476_p4 = scmp.lt.s32.totalorder %s26_s25, %s26_s25 }
   0x9   :  { %p472_p3 = scmp.ne.s32.totalorder %s26_s25, %s471_s10  ;;  %p477_p5 = scmp.lt.s32.totalorder %s471_s10, %s471_s10 }
   0xb   :  { %p478_p6 = por %p477_p5, %p476_p4 }
   0xd   :  { %p479_p7 = pnand %p478_p6, %p472_p3 }
   0xf   :  { %482 = shalt.err (!%p479_p7)
}
  0x10   :  { %s510_s11 = smov 64   ;;  %s511_s12 = smov 4  }
  0x11   :  { %31 = dma.hbm_to_vmem [thread:$0]  %s623_s3, 1024, %s26_s25, [#allocation3], %s510_s11, %s510_s11, %s511_s12  }
  0x12   :  { %s512_s15 = smov [#allocation4]   ;;  %s483_s19 = scalar_lea.hbm %s625_s5, 1024 }
  0x13   :  { %s39_s16 = sshll.u32 %s512_s15, 4  ;;  %p484_p8 = scmp.ne.s32.totalorder %s625_s5, %s483_s19  ;;  %s40_s16 = int_to_ptr.vmem [resolvable:$true] %s39_s16 }
  0x14   :  { %p487_p9 = scmp.lt.u32.totalorder %s483_s19, %s625_s5 }
  0x16   :  { %p489_p10 = pnand %p487_p9, %p484_p8 }
  0x18   :  { %492 = shalt.err (!%p489_p10)
}
  0x19   :  { %s493_s24 = scalar_lea.vmem %s40_s16, 1024  ;;  %p498_p12 = scmp.lt.s32.totalorder %s40_s16, %s40_s16 }
  0x1a   :  { %p494_p11 = scmp.ne.s32.totalorder %s40_s16, %s493_s24  ;;  %p499_p13 = scmp.lt.s32.totalorder %s493_s24, %s493_s24 }
  0x1c   :  { %p500_p0 = por %p499_p13, %p498_p12 }
  0x1e   :  { %p501_p1 = pnand %p500_p0, %p494_p11 }
  0x20   :  { %504 = shalt.err (!%p501_p1)
}
  0x21   :  { %45 = dma.hbm_to_vmem [thread:$0]  %s625_s5, 1024, %s40_s16, [#allocation5], %s510_s11, %s510_s11, %s511_s12  }
  0x22   :  { %505 = dma.done.wait [#allocation3], 1024  }
  0x23   :  { %506 = vsyncadd [#allocation3], 4294966272 }
  0x24   :  { %507 = dma.done.wait [#allocation5], 1024  }
  0x25   :  { %508 = vsyncadd [#allocation5], 4294966272  ;;  %v513_v0 = vmov 0.0   ;;  %vm514_vm0 = vmmov 0   ;;  %vm74_vm1 = vcmask 1045504   ;;  %vm70_vm2 = vcmask 97280  }
  0x26   :  { %392 = vmatprep.subr.bf16.mxu0 %v513_v0  ;;  %394 = vmatprep.mubr.msk.bf16.mxu0 %vm514_vm0, %v513_v0  ;;  %v444_v1 = vld [vmem:[%s621_s1] sm:$0x3f]   ;;  %v446_v5 = vld [vmem:[#allocation2 + $0x8] sm:$0xff]   ;;  %v447_v6 = vld [vmem:[#allocation2 + $0x10] sm:$0xff]  }
  0x27   :  { %398 = vmatprep.subr.bf16.mxu1 %v513_v0  ;;  %414 = vmatprep.mubr.msk.bf16.mxu1 %vm514_vm0, %v513_v0  ;;  %v76_v2 = vsel %vm74_vm1, %v444_v1, 0  ;;  %v445_v3 = vld [vmem:[#allocation2] sm:$0xff]   ;;  %v448_v7 = vld [vmem:[#allocation2 + $0x18] sm:$0xff]   ;;  %v450_v9 = vld [vmem:[#allocation2 + $0x28] sm:$0xff]  }
  0x28   :  { %393 = vmatpush3.bf16.msra.mxu0 %v76_v2  ;;  %v55_v4 = vld [vmem:[%s620_s0] sm:$0x1]  ;;  %399 = vmatpush3.bf16.msra.mxu1 %v445_v3  ;;  %v451_v10 = vld [vmem:[#allocation2 + $0x30] sm:$0xff]   ;;  %v452_v11 = vld [vmem:[#allocation2 + $0x38] sm:$0xff]  }
  0x29   :  { %418 = vmatprep.subr.bf16.mxu0 %v513_v0  ;;  %400 = vmatprep.subr.bf16.mxu1 %v513_v0  ;;  %v449_v8 = vld [vmem:[#allocation2 + $0x20] sm:$0xff]   ;;  %v454_v13 = vld [vmem:[#allocation4 + $0x8] sm:$0xff]   ;;  %v455_v14 = vld [vmem:[#allocation4 + $0x10] sm:$0xff]  }
  0x2a   :  { %v453_v12 = vld [vmem:[#allocation4] sm:$0xff]   ;;  %v456_v15 = vld [vmem:[#allocation4 + $0x18] sm:$0xff]   ;;  %v458_v17 = vld [vmem:[#allocation4 + $0x28] sm:$0xff]  }
  0x2b   :  { %395 = vmatmul.mubr.msk.bf16.vlgmr.msra.gmra.mrb[0].mxu0 %vm70_vm2, %v55_v4  ;;  %v457_v16 = vld [vmem:[#allocation4 + $0x20] sm:$0xff]   ;;  %v459_v26 = vld [vmem:[#allocation4 + $0x30] sm:$0xff]   ;;  %v460_v27 = vld [vmem:[#allocation4 + $0x38] sm:$0xff]  }
  0x2c   :  { %434 = vmatprep.mubr.msk.bf16.mxu0 %vm514_vm0, %v513_v0  ;;  %401 = vmatpush3.bf16.msra.mxu1 %v446_v5  ;;  %v351_v18 = vld [vmem:[%s622_s2] ss:$0 sm:$0xff] }
  0x2d   :  { %402 = vmatprep.subr.bf16.mxu1 %v513_v0  ;;  %419 = vmatpush3.bf16.msra.mxu0 %v453_v12  ;;  %v354_v28 = vld [vmem:[%s624_s4] ss:$0 sm:$0xff] }
  0x2e   :  { %420 = vmatprep.subr.bf16.mxu0 %v513_v0  ;;  %v363_v36 = vld [vmem:[%s626_s6] ss:$0 sm:$0xff] }
  0x30   :  { %403 = vmatpush3.bf16.msra.mxu1 %v447_v6 }
  0x31   :  { %404 = vmatprep.subr.bf16.mxu1 %v513_v0  ;;  %421 = vmatpush3.bf16.msra.mxu0 %v454_v13 }
  0x32   :  { %422 = vmatprep.subr.bf16.mxu0 %v513_v0 }
  0x34   :  { %405 = vmatpush3.bf16.msra.mxu1 %v448_v7 }
  0x35   :  { %406 = vmatprep.subr.bf16.mxu1 %v513_v0  ;;  %423 = vmatpush3.bf16.msra.mxu0 %v455_v14 }
  0x36   :  { %424 = vmatprep.subr.bf16.mxu0 %v513_v0 }
  0x38   :  { %407 = vmatpush3.bf16.msra.mxu1 %v449_v8 }
  0x39   :  { %408 = vmatprep.subr.bf16.mxu1 %v513_v0  ;;  %425 = vmatpush3.bf16.msra.mxu0 %v456_v15 }
  0x3a   :  { %426 = vmatprep.subr.bf16.mxu0 %v513_v0 }
  0x3c   :  { %409 = vmatpush3.bf16.msra.mxu1 %v450_v9 }
  0x3d   :  { %410 = vmatprep.subr.bf16.mxu1 %v513_v0  ;;  %427 = vmatpush3.bf16.msra.mxu0 %v457_v16 }
  0x3e   :  { %428 = vmatprep.subr.bf16.mxu0 %v513_v0 }
  0x40   :  { %411 = vmatpush3.bf16.msra.mxu1 %v451_v10 }
  0x41   :  { %412 = vmatprep.subr.bf16.mxu1 %v513_v0  ;;  %429 = vmatpush3.bf16.msra.mxu0 %v458_v17 }
  0x42   :  { %430 = vmatprep.subr.bf16.mxu0 %v513_v0 }
  0x44   :  { %413 = vmatpush3.bf16.msra.mxu1 %v452_v11 }
  0x45   :  { %431 = vmatpush3.bf16.msra.mxu0 %v459_v26 }
  0x46   :  { %432 = vmatprep.subr.bf16.mxu0 %v513_v0 }
  0x49   :  { %433 = vmatpush3.bf16.msra.mxu0 %v460_v27 }
  0xfe   :  { %v112_v19 = vpop.f32.mrb[0].mxu0 }
  0xff   :  { %v113_v20 = vadd.f32 %v351_v18, %v112_v19  ;;  %v396_v21 = vpop.f32.mrb[1].mxu0 }
 0x100   :  { %v115_v22 = vpop.f32.mrb[2].mxu0 }
 0x101   :  { %v118_v23 = vmax.f32 %v113_v20, 0.0  ;;  %v397_v24 = vpop.f32.mrb[3].mxu0 }
 0x103   :  { %v119_v25 = vpack.c.bf16 %v118_v23, %v118_v23 }
 0x105   :  { %415 = vmatmul.mubr.bf16.vlgmr.msra.gmra.mrb[0].mxu1 %v119_v25 }
 0x1d8   :  { %v225_v29 = vpop.f32.mrb[0].mxu1 }
 0x1d9   :  { %v226_v30 = vadd.f32 %v354_v28, %v225_v29  ;;  %v416_v31 = vpop.f32.mrb[1].mxu1 }
 0x1da   :  { %v228_v32 = vpop.f32.mrb[2].mxu1 }
 0x1db   :  { %v231_v33 = vmax.f32 %v226_v30, 0.0  ;;  %v417_v34 = vpop.f32.mrb[3].mxu1 }
 0x1dd   :  { %v232_v35 = vpack.c.bf16 %v231_v33, %v231_v33 }
 0x1df   :  { %435 = vmatmul.mubr.bf16.vlgmr.msra.gmra.mrb[4].mxu0 %v232_v35 }
 0x2b2   :  { %v338_v37 = vpop.f32.mrb[4].mxu0 }
 0x2b3   :  { %v339_v38 = vadd.f32 %v363_v36, %v338_v37  ;;  %v436_v39 = vpop.f32.mrb[5].mxu0 }
 0x2b4   :  { %v341_v40 = vpop.f32.mrb[6].mxu0 }
 0x2b5   :  { %344 = vst [vmem:[%s627_s7] sm:$0x3] %v339_v38  ;;  %v437_v41 = vpop.f32.mrb[7].mxu0 }
 0x2b6   :  { %349 = vsyncpa [#allocation3], 1 }
 0x2b7   :  { %350 = vsyncpa [#allocation5], 1 }

</bundles_post_ra>
